<compile_context>
chip_gen: v5e
topology: v5e:2x2
jax: 0.10.0
libtpu: 0.0.40
codegen_flags: <defaults>
</compile_context>

<pallas_src>
import functools

import jax
import jax.numpy as jnp
from jax.experimental import pallas as pl
from jax.experimental.pallas import tpu as pltpu


def _round_up(x, m):
    return (x + m - 1) // m * m


def _decoder_mlp_kernel(n_layers, *refs):
    """Fused MLP chain for one batch tile.

    refs = (z_ref, W1_ref, b1_ref, ..., WL_ref, bL_ref, out_ref)
      z_ref   : (TILE_B, d0_p)         activation dtype
      Wi_ref  : (d_{i-1}_p, d_i_p)     weight dtype (bf16 by default)
      bi_ref  : (1, d_i_p)             float32
      out_ref : (TILE_B, dL_p)
    """
    z_ref = refs[0]
    out_ref = refs[-1]
    param_refs = refs[1:-1]

    h = z_ref[...].astype(jnp.float32)
    for i in range(n_layers):
        w = param_refs[2 * i][...]                          # (d_in_p, d_out_p)
        b = param_refs[2 * i + 1][...].astype(jnp.float32)  # (1, d_out_p)
        # MXU matmul in the weight dtype (bf16 fast path), f32 accumulate.
        acc = jnp.dot(h.astype(w.dtype), w, preferred_element_type=jnp.float32)
        # bias-add + ReLU in f32 (ReLU after every linear, incl. the last one).
        h = jnp.maximum(acc + b, 0.0)
    out_ref[...] = h.astype(out_ref.dtype)


def decoder_rna_forward(z, params, *, tile_b=256, weight_dtype=jnp.bfloat16):
    """DecoderRNA forward.

    z      : (B, n_input) float32
    params : list of (W_i, b_i) with W_i shaped (d_in, d_out), b_i shaped (d_out,)
    Returns (B, n_output) in z.dtype.
    """
    B, n_in = z.shape
    n_layers = len(params)
    assert n_layers >= 1

    # Layer dims and their lane-padded (multiple-of-128) versions.
    dims = [n_in] + [w.shape[1] for w, _ in params]
    dims_p = [_round_up(d, 128) for d in dims]
    n_out, n_out_p = dims[-1], dims_p[-1]

    # Batch tile: full MXU tile when batch is large, otherwise a single
    # sublane-aligned block (grid of 1) to avoid padding tiny batches to 256.
    tile_b = min(tile_b, _round_up(B, 8))
    b_pad = _round_up(B, tile_b)
    grid = (b_pad // tile_b,)

    # Zero-pad the input (padded lanes/rows contribute nothing that survives
    # the final slice: padded feature columns stay exactly 0 through the chain
    # because padded weight rows/cols and padded bias entries are 0).
    z_p = jnp.zeros((b_pad, dims_p[0]), z.dtype).at[:B, :n_in].set(z)

    flat_params = []
    for i, (w, b) in enumerate(params):
        d_i, d_o = dims[i], dims[i + 1]
        w_p = (jnp.zeros((dims_p[i], dims_p[i + 1]), weight_dtype)
               .at[:d_i, :d_o].set(w.astype(weight_dtype)))
        b_p = (jnp.zeros((1, dims_p[i + 1]), jnp.float32)
               .at[0, :d_o].set(b.astype(jnp.float32)))
        flat_params += [w_p, b_p]

    # BlockSpecs: batch-tiled z/out, weight/bias resident (constant index_map).
    in_specs = [pl.BlockSpec((tile_b, dims_p[0]), lambda i: (i, 0))]
    for li in range(n_layers):
        d_i, d_o = dims_p[li], dims_p[li + 1]
        in_specs.append(pl.BlockSpec((d_i, d_o), lambda i: (0, 0)))
        in_specs.append(pl.BlockSpec((1, d_o), lambda i: (0, 0)))
    out_spec = pl.BlockSpec((tile_b, n_out_p), lambda i: (i, 0))

    # VMEM budget: 2x double-buffered I/O tiles + resident params + activations.
    wd_bytes = jnp.dtype(weight_dtype).itemsize
    param_bytes = sum(dims_p[i] * dims_p[i + 1] * wd_bytes + dims_p[i + 1] * 4
                      for i in range(n_layers))
    io_bytes = tile_b * (dims_p[0] + n_out_p) * 4
    act_bytes = 2 * tile_b * max(dims_p) * 4
    demand = 2 * (param_bytes + io_bytes) + act_bytes
    vmem_limit = min(128 * 1024 * 1024, max(32 * 1024 * 1024, demand + (4 << 20)))

    flops = 2 * b_pad * sum(dims_p[i] * dims_p[i + 1] for i in range(n_layers))
    bytes_accessed = (z_p.size * z_p.dtype.itemsize
                      + sum(p.size * p.dtype.itemsize for p in flat_params)
                      + b_pad * n_out_p * z.dtype.itemsize)

    kernel = functools.partial(_decoder_mlp_kernel, n_layers)

    out_p = pl.pallas_call(
        kernel,
        out_shape=jax.ShapeDtypeStruct((b_pad, n_out_p), z.dtype),
        grid=grid,
        in_specs=in_specs,
        out_specs=out_spec,
        compiler_params=pltpu.CompilerParams(
            dimension_semantics=("parallel",),
            vmem_limit_bytes=int(vmem_limit),
        ),
        cost_estimate=pl.CostEstimate(
            flops=int(flops), transcendentals=0, bytes_accessed=int(bytes_accessed)),
    )(z_p, *flat_params)

    return out_p[:B, :n_out]


def _init_params(key, layer_dims):
    """Deterministic Kaiming-ish init for the Linear layers (f32 masters)."""
    params = []
    for i, (d_in, d_out) in enumerate(zip(layer_dims[:-1], layer_dims[1:])):
        kw, kb, key = jax.random.split(jax.random.fold_in(key, i), 3)
        bound = 1.0 / jnp.sqrt(d_in)
        w = jax.random.uniform(kw, (d_in, d_out), jnp.float32, -bound, bound)
        b = jax.random.uniform(kb, (d_out,), jnp.float32, -bound, bound)
        params.append((w, b))
    return params


def _reference_forward(z, params, weight_dtype=jnp.bfloat16):
    """Pure-JAX reference with matching precision (bf16 matmul, f32 accumulate)."""
    h = z.astype(jnp.float32)
    for w, b in params:
        acc = jnp.dot(h.astype(weight_dtype), w.astype(weight_dtype),
                      preferred_element_type=jnp.float32)
        h = jnp.maximum(acc + b.astype(jnp.float32), 0.0)
    return h.astype(z.dtype)


if __name__ == "__main__":
    key = jax.random.PRNGKey(0)

    # Case 1: DecoderRNA(n_input=32, n_output=64, n_hidden=[64, 128]), batch=8.
    n_input, n_hidden, n_output = 32, [64, 128], 64
    batch = 8
    layer_dims = [n_input] + n_hidden + [n_output]
    kz, kp, key = jax.random.split(key, 3)
    z = jax.random.normal(kz, (batch, n_input), jnp.float32)
    params = _init_params(kp, layer_dims)

    y = jax.block_until_ready(decoder_rna_forward(z, params))
    y_ref = _reference_forward(z, params)
    assert y.shape == (batch, n_output)
    assert jnp.allclose(y, y_ref, atol=2e-2, rtol=2e-2)

    # Case 2: exercises a batch grid > 1 (tile_b=128) and non-multiple shapes.
    n_input2, n_hidden2, n_output2 = 16, [128], 200
    batch2 = 200
    layer_dims2 = [n_input2] + n_hidden2 + [n_output2]
    kz2, kp2 = jax.random.split(key)
    z2 = jax.random.normal(kz2, (batch2, n_input2), jnp.float32)
    params2 = _init_params(kp2, layer_dims2)

    y2 = jax.block_until_ready(decoder_rna_forward(z2, params2, tile_b=128))
    y2_ref = _reference_forward(z2, params2)
    assert y2.shape == (batch2, n_output2)
    assert jnp.allclose(y2, y2_ref, atol=2e-2, rtol=2e-2)

    print("KERNEL_OK")
</pallas_src>

<mosaic_0001>
module attributes {stable_mosaic.version = 11 : i64} {
  func.func @_decoder_mlp_kernel(%arg0: i32, %arg1: memref<8x128xf32, #tpu.memory_space<vmem>>, %arg2: memref<128x128xbf16, #tpu.memory_space<vmem>>, %arg3: memref<1x128xf32, #tpu.memory_space<vmem>>, %arg4: memref<128x128xbf16, #tpu.memory_space<vmem>>, %arg5: memref<1x128xf32, #tpu.memory_space<vmem>>, %arg6: memref<128x128xbf16, #tpu.memory_space<vmem>>, %arg7: memref<1x128xf32, #tpu.memory_space<vmem>>, %arg8: memref<8x128xf32, #tpu.memory_space<vmem>>) attributes {dimension_semantics = [#tpu.dimension_semantics<parallel>], iteration_bounds = array<i64: 1>, scalar_prefetch = 0 : i64, scratch_operands = 0 : i64, tpu.core_type = #tpu.core_type<tc>, window_params = [{transform_indices = @transform_0, window_bounds = array<i64: 8, 128>}, {pipeline_mode = #tpu.pipeline_mode<synchronous>, transform_indices = @transform_1, window_bounds = array<i64: 128, 128>}, {pipeline_mode = #tpu.pipeline_mode<synchronous>, transform_indices = @transform_2, window_bounds = array<i64: 1, 128>}, {pipeline_mode = #tpu.pipeline_mode<synchronous>, transform_indices = @transform_3, window_bounds = array<i64: 128, 128>}, {pipeline_mode = #tpu.pipeline_mode<synchronous>, transform_indices = @transform_4, window_bounds = array<i64: 1, 128>}, {pipeline_mode = #tpu.pipeline_mode<synchronous>, transform_indices = @transform_5, window_bounds = array<i64: 128, 128>}, {pipeline_mode = #tpu.pipeline_mode<synchronous>, transform_indices = @transform_6, window_bounds = array<i64: 1, 128>}, {transform_indices = @transform_7, window_bounds = array<i64: 8, 128>}]} {
    %c0 = arith.constant 0 : index
    %c0_0 = arith.constant 0 : index
    %0 = vector.load %arg1[%c0, %c0_0] : memref<8x128xf32, #tpu.memory_space<vmem>>, vector<8x128xf32>
    %c0_1 = arith.constant 0 : index
    %c0_2 = arith.constant 0 : index
    %1 = vector.load %arg2[%c0_1, %c0_2] : memref<128x128xbf16, #tpu.memory_space<vmem>>, vector<128x128xbf16>
    %c0_3 = arith.constant 0 : index
    %c0_4 = arith.constant 0 : index
    %2 = vector.load %arg3[%c0_3, %c0_4] : memref<1x128xf32, #tpu.memory_space<vmem>>, vector<1x128xf32>
    %3 = arith.truncf %0 : vector<8x128xf32> to vector<8x128xbf16>
    %cst = arith.constant dense<0.000000e+00> : vector<8x128xf32>
    %4 = tpu.matmul %3, %1, %cst {dimension_numbers = #tpu.dot_dimension_numbers<[1], [0], [0], [1], [0, 0, 1, 1], [], []>} : vector<8x128xbf16>, vector<128x128xbf16>, vector<8x128xf32> -> vector<8x128xf32>
    %5 = vector.broadcast %2 : vector<1x128xf32> to vector<8x128xf32>
    %6 = arith.addf %4, %5 : vector<8x128xf32>
    %cst_5 = arith.constant 0.000000e+00 : f32
    %7 = vector.broadcast %cst_5 : f32 to vector<8x128xf32>
    %8 = arith.maximumf %6, %7 : vector<8x128xf32>
    %c0_6 = arith.constant 0 : index
    %c0_7 = arith.constant 0 : index
    %9 = vector.load %arg4[%c0_6, %c0_7] : memref<128x128xbf16, #tpu.memory_space<vmem>>, vector<128x128xbf16>
    %c0_8 = arith.constant 0 : index
    %c0_9 = arith.constant 0 : index
    %10 = vector.load %arg5[%c0_8, %c0_9] : memref<1x128xf32, #tpu.memory_space<vmem>>, vector<1x128xf32>
    %11 = arith.truncf %8 : vector<8x128xf32> to vector<8x128xbf16>
    %cst_10 = arith.constant dense<0.000000e+00> : vector<8x128xf32>
    %12 = tpu.matmul %11, %9, %cst_10 {dimension_numbers = #tpu.dot_dimension_numbers<[1], [0], [0], [1], [0, 0, 1, 1], [], []>} : vector<8x128xbf16>, vector<128x128xbf16>, vector<8x128xf32> -> vector<8x128xf32>
    %13 = vector.broadcast %10 : vector<1x128xf32> to vector<8x128xf32>
    %14 = arith.addf %12, %13 : vector<8x128xf32>
    %cst_11 = arith.constant 0.000000e+00 : f32
    %15 = vector.broadcast %cst_11 : f32 to vector<8x128xf32>
    %16 = arith.maximumf %14, %15 : vector<8x128xf32>
    %c0_12 = arith.constant 0 : index
    %c0_13 = arith.constant 0 : index
    %17 = vector.load %arg6[%c0_12, %c0_13] : memref<128x128xbf16, #tpu.memory_space<vmem>>, vector<128x128xbf16>
    %c0_14 = arith.constant 0 : index
    %c0_15 = arith.constant 0 : index
    %18 = vector.load %arg7[%c0_14, %c0_15] : memref<1x128xf32, #tpu.memory_space<vmem>>, vector<1x128xf32>
    %19 = arith.truncf %16 : vector<8x128xf32> to vector<8x128xbf16>
    %cst_16 = arith.constant dense<0.000000e+00> : vector<8x128xf32>
    %20 = tpu.matmul %19, %17, %cst_16 {dimension_numbers = #tpu.dot_dimension_numbers<[1], [0], [0], [1], [0, 0, 1, 1], [], []>} : vector<8x128xbf16>, vector<128x128xbf16>, vector<8x128xf32> -> vector<8x128xf32>
    %21 = vector.broadcast %18 : vector<1x128xf32> to vector<8x128xf32>
    %22 = arith.addf %20, %21 : vector<8x128xf32>
    %cst_17 = arith.constant 0.000000e+00 : f32
    %23 = vector.broadcast %cst_17 : f32 to vector<8x128xf32>
    %24 = arith.maximumf %22, %23 : vector<8x128xf32>
    %c0_18 = arith.constant 0 : index
    %c0_19 = arith.constant 0 : index
    %25 = vector.load %arg8[%c0_18, %c0_19] : memref<8x128xf32, #tpu.memory_space<vmem>>, vector<8x128xf32>
    tpu.vector_store %arg8[%c0_18, %c0_19], %24 {strides = array<i32>} : memref<8x128xf32, #tpu.memory_space<vmem>>, vector<8x128xf32>,
    return
  }
  func.func @transform_0(%arg0: i32) -> (i32, i32) {
    %c0_i32 = arith.constant 0 : i32
    %c0_i32_0 = arith.constant 0 : i32
    return %arg0, %c0_i32 : i32, i32
  }
  func.func @transform_1(%arg0: i32) -> (i32, i32) {
    %c0_i32 = arith.constant 0 : i32
    %c0_i32_0 = arith.constant 0 : i32
    %c0_i32_1 = arith.constant 0 : i32
    return %c0_i32, %c0_i32_0 : i32, i32
  }
  func.func @transform_2(%arg0: i32) -> (i32, i32) {
    %c0_i32 = arith.constant 0 : i32
    %c0_i32_0 = arith.constant 0 : i32
    %c0_i32_1 = arith.constant 0 : i32
    return %c0_i32, %c0_i32_0 : i32, i32
  }
  func.func @transform_3(%arg0: i32) -> (i32, i32) {
    %c0_i32 = arith.constant 0 : i32
    %c0_i32_0 = arith.constant 0 : i32
    %c0_i32_1 = arith.constant 0 : i32
    return %c0_i32, %c0_i32_0 : i32, i32
  }
  func.func @transform_4(%arg0: i32) -> (i32, i32) {
    %c0_i32 = arith.constant 0 : i32
    %c0_i32_0 = arith.constant 0 : i32
    %c0_i32_1 = arith.constant 0 : i32
    return %c0_i32, %c0_i32_0 : i32, i32
  }
  func.func @transform_5(%arg0: i32) -> (i32, i32) {
    %c0_i32 = arith.constant 0 : i32
    %c0_i32_0 = arith.constant 0 : i32
    %c0_i32_1 = arith.constant 0 : i32
    return %c0_i32, %c0_i32_0 : i32, i32
  }
  func.func @transform_6(%arg0: i32) -> (i32, i32) {
    %c0_i32 = arith.constant 0 : i32
    %c0_i32_0 = arith.constant 0 : i32
    %c0_i32_1 = arith.constant 0 : i32
    return %c0_i32, %c0_i32_0 : i32, i32
  }
  func.func @transform_7(%arg0: i32) -> (i32, i32) {
    %c0_i32 = arith.constant 0 : i32
    %c0_i32_0 = arith.constant 0 : i32
    return %arg0, %c0_i32 : i32, i32
  }
}

</mosaic_0001>

<bundles_post_ra>
// kernel: tpu_custom_call.1
= control target key start
LH: loop header
LB: loop body
LE: loop exit
PB: predicated region body
PF: predicated region fallthrough
CT: control target
= control target key end

     0   :  { %12 = vsyncpa [#allocation3], 0  ;;  %s687_s0 = inlined_call_operand.hbm [shape: f32[8,128], index: 0, kind: input, shape index: {}]   ;;  %s688_s1 = inlined_call_operand.hbm [shape: bf16[128,128], index: 1, kind: input, shape index: {}]   ;;  %s689_s2 = inlined_call_operand.vmem [shape: f32[1,128], index: 2, kind: input, shape index: {}]   ;;  %s690_s3 = inlined_call_operand.hbm [shape: bf16[128,128], index: 3, kind: input, shape index: {}]   ;;  %s691_s4 = inlined_call_operand.vmem [shape: f32[1,128], index: 4, kind: input, shape index: {}]   ;;  %s692_s5 = inlined_call_operand.hbm [shape: bf16[128,128], index: 5, kind: input, shape index: {}]   ;;  %s693_s6 = inlined_call_operand.vmem [shape: f32[1,128], index: 6, kind: input, shape index: {}]   ;;  %s694_s7 = inlined_call_operand.hbm [shape: f32[8,128], index: 7, kind: output, shape index: {}]  }
   0x1   :  { %13 = vsyncpa [#allocation6], 0 }
   0x2   :  { %14 = vsyncpa [#allocation9], 0  ;;  %s31_s26 = sshll.u32 %s688_s1, 4  ;;  %s32_s26 = int_to_ptr.hbm [resolvable:$true] %s31_s26 }
   0x3   :  { %15 = vsyncpa [#allocation4], 0  ;;  %s616_s27 = smov [#allocation5]   ;;  %s21_s8 = sshll.u32 %s687_s0, 4  ;;  %s22_s8 = int_to_ptr.hbm [resolvable:$true] %s21_s8 }
   0x4   :  { %s33_s28 = sshll.u32 %s616_s27, 4  ;;  %s617_s9 = smov 64   ;;  %s34_s28 = int_to_ptr.vmem [resolvable:$true] %s33_s28 }
   0x5   :  { %s618_s10 = smov 4   ;;  %s619_s11 = smov [#allocation2]  }
   0x6   :  { %39 = dma.hbm_to_vmem [thread:$0]  %s32_s26, 1024, %s34_s28, [#allocation6], %s617_s9, %s617_s9, %s618_s10  }
   0x7   :  { %s23_s12 = sshll.u32 %s619_s11, 4  ;;  %s46_s15 = sshll.u32 %s690_s3, 4  ;;  %s24_s12 = int_to_ptr.vmem [resolvable:$true] %s23_s12  ;;  %s47_s15 = int_to_ptr.hbm [resolvable:$true] %s46_s15 }
   0x8   :  { %26 = dma.hbm_to_vmem [thread:$0]  %s22_s8, 128, %s24_s12, [#allocation3]  }
   0x9   :  { %s61_s17 = sshll.u32 %s692_s5, 4  ;;  %s620_s18 = smov [#allocation7]   ;;  %s62_s17 = int_to_ptr.hbm [resolvable:$true] %s61_s17 }
   0xa   :  { %s48_s19 = sshll.u32 %s620_s18, 4  ;;  %s621_s0 = smov [#allocation8]   ;;  %s49_s19 = int_to_ptr.vmem [resolvable:$true] %s48_s19 }
   0xb   :  { %54 = dma.hbm_to_vmem [thread:$0]  %s47_s15, 1024, %s49_s19, [#allocation6], %s617_s9, %s617_s9, %s618_s10  }
   0xc   :  { %s63_s20 = sshll.u32 %s621_s0, 4  ;;  %s64_s20 = int_to_ptr.vmem [resolvable:$true] %s63_s20 }
   0xd   :  { %69 = dma.hbm_to_vmem [thread:$0]  %s62_s17, 1024, %s64_s20, [#allocation9], %s617_s9, %s617_s9, %s618_s10  }
   0xe   :  { %608 = dma.done.wait [#allocation3], 128  }
   0xf   :  { %609 = vsyncadd [#allocation3], 4294967168 }
  0x10   :  { %610 = dma.done.wait [#allocation6], 2048  }
  0x11   :  { %611 = vsyncadd [#allocation6], 4294965248 }
  0x12   :  { %612 = dma.done.wait [#allocation9], 1024  }
  0x13   :  { %613 = vsyncadd [#allocation9], 4294966272  ;;  %v461_v0 = vld [vmem:[#allocation5 + $0x38] sm:$0xff]  ;;  %v460_v1 = vld [vmem:[#allocation5 + $0x30] sm:$0xff]  ;;  %s622_s24 = smov [#allocation10]   ;;  %s346_s28 = sshll.u32 %s694_s7, 4  ;;  %s347_s28 = int_to_ptr.hbm [resolvable:$true] %s346_s28 }
  0x14   :  { %158 = vmatpush.bf16.msra.mxu0 %v461_v0  ;;  %v469_v2 = vld [vmem:[#allocation7 + $0x38] sm:$0xff]  ;;  %v468_v3 = vld [vmem:[#allocation7 + $0x30] sm:$0xff]  ;;  %v459_v4 = vld [vmem:[#allocation5 + $0x28] sm:$0xff]  ;;  %s344_s25 = sshll.u32 %s622_s24, 4  ;;  %s345_s25 = int_to_ptr.vmem [resolvable:$true] %s344_s25 }
  0x15   :  { %241 = vmatpush.bf16.msra.mxu1 %v469_v2  ;;  %v467_v5 = vld [vmem:[#allocation7 + $0x28] sm:$0xff]  ;;  %v458_v6 = vld [vmem:[#allocation5 + $0x20] sm:$0xff]  ;;  %v457_v8 = vld [vmem:[#allocation5 + $0x18] sm:$0xff] }
  0x16   :  { %v466_v7 = vld [vmem:[#allocation7 + $0x20] sm:$0xff]  ;;  %v465_v9 = vld [vmem:[#allocation7 + $0x18] sm:$0xff]  ;;  %v456_v10 = vld [vmem:[#allocation5 + $0x10] sm:$0xff] }
  0x17   :  { %v464_v11 = vld [vmem:[#allocation7 + $0x10] sm:$0xff]  ;;  %v455_v12 = vld [vmem:[#allocation5 + $0x8] sm:$0xff]  ;;  %v454_v13 = vld [vmem:[#allocation5] sm:$0xff] }
  0x18   :  { %159 = vmatpush.bf16.msra.mxu0 %v460_v1  ;;  %v88_v14 = vld [vmem:[#allocation2] sm:$0xff]  ;;  %v463_v16 = vld [vmem:[#allocation7 + $0x8] sm:$0xff]  ;;  %v462_v17 = vld [vmem:[#allocation7] sm:$0xff] }
  0x19   :  { %242 = vmatpush.bf16.msra.mxu1 %v468_v3  ;;  %v106_v15 = vpack.c.bf16 %v88_v14, %v88_v14  ;;  %v477_v18 = vld [vmem:[#allocation8 + $0x38] sm:$0xff]  ;;  %v476_v19 = vld [vmem:[#allocation8 + $0x30] sm:$0xff]  ;;  %v475_v20 = vld [vmem:[#allocation8 + $0x28] sm:$0xff] }
  0x1a   :  { %324 = vmatpush.bf16.msra.mxu2 %v477_v18  ;;  %v474_v21 = vld [vmem:[#allocation8 + $0x20] sm:$0xff]  ;;  %v473_v22 = vld [vmem:[#allocation8 + $0x18] sm:$0xff]  ;;  %v472_v23 = vld [vmem:[#allocation8 + $0x10] sm:$0xff] }
  0x1b   :  { %v485_v24 = vld [vmem:[%s689_s2] ss:$0 sm:$0xff]  ;;  %v471_v30 = vld [vmem:[#allocation8 + $0x8] sm:$0xff]  ;;  %v470_v31 = vld [vmem:[#allocation8] sm:$0xff] }
  0x1c   :  { %160 = vmatpush.bf16.msra.mxu0 %v459_v4  ;;  %v486_v32 = vld [vmem:[%s691_s4] ss:$0 sm:$0xff] }
  0x1d   :  { %243 = vmatpush.bf16.msra.mxu1 %v467_v5  ;;  %v487_v38 = vld [vmem:[%s693_s6] ss:$0 sm:$0xff] }
  0x1e   :  { %325 = vmatpush.bf16.msra.mxu2 %v476_v19 }
  0x20   :  { %161 = vmatpush.bf16.msra.mxu0 %v458_v6 }
  0x21   :  { %244 = vmatpush.bf16.msra.mxu1 %v466_v7 }
  0x22   :  { %326 = vmatpush.bf16.msra.mxu2 %v475_v20 }
  0x24   :  { %162 = vmatpush.bf16.msra.mxu0 %v457_v8 }
  0x25   :  { %245 = vmatpush.bf16.msra.mxu1 %v465_v9 }
  0x26   :  { %327 = vmatpush.bf16.msra.mxu2 %v474_v21 }
  0x28   :  { %163 = vmatpush.bf16.msra.mxu0 %v456_v10 }
  0x29   :  { %246 = vmatpush.bf16.msra.mxu1 %v464_v11 }
  0x2a   :  { %328 = vmatpush.bf16.msra.mxu2 %v473_v22 }
  0x2c   :  { %164 = vmatpush.bf16.msra.mxu0 %v455_v12 }
  0x2d   :  { %247 = vmatpush.bf16.msra.mxu1 %v463_v16 }
  0x2e   :  { %329 = vmatpush.bf16.msra.mxu2 %v472_v23 }
  0x30   :  { %165 = vmatpush.bf16.msra.mxu0 %v454_v13 }
  0x31   :  { %248 = vmatpush.bf16.msra.mxu1 %v462_v17 }
  0x32   :  { %330 = vmatpush.bf16.msra.mxu2 %v471_v30 }
  0x33   :  { %166 = vmatmul.bf16.vlgmr.msra.gmra.mxu0 %v106_v15 }
  0x36   :  { %331 = vmatpush.bf16.msra.mxu2 %v470_v31 }
  0xb0   :  { %v167_v25 = vpop.f32.mrf.mxu0 }
  0xb1   :  { %v168_v26 = vadd.f32 %v485_v24, %v167_v25 }
  0xb3   :  { %v171_v27 = vmax.f32 %v168_v26, 0.0 }
  0xb5   :  { %v189_v28 = vpack.c.bf16 %v171_v27, %v171_v27 }
  0xb7   :  { %249 = vmatmul.bf16.vlgmr.msra.gmra.mxu1 %v189_v28 }
  0xb8   :  { %v169_v29 = vpop.f32.mrf.mxu0 }
 0x134   :  { %v250_v33 = vpop.f32.mrf.mxu1 }
 0x135   :  { %v251_v34 = vadd.f32 %v486_v32, %v250_v33 }
 0x137   :  { %v254_v35 = vmax.f32 %v251_v34, 0.0 }
 0x139   :  { %v272_v36 = vpack.c.bf16 %v254_v35, %v254_v35 }
 0x13b   :  { %332 = vmatmul.bf16.vlgmr.msra.gmra.mxu2 %v272_v36 }
 0x13c   :  { %v252_v37 = vpop.f32.mrf.mxu1 }
 0x1be   :  { %v333_v39 = vpop.f32.mrf.mxu2 }
 0x1bf   :  { %v334_v40 = vadd.f32 %v487_v38, %v333_v39 }
 0x1c1   :  { %v337_v41 = vmax.f32 %v334_v40, 0.0 }
 0x1c3   :  { %338 = vst [vmem:[#allocation10] sm:$0xff] %v337_v41 }
 0x1c4   :  { %349 = dma.vmem_to_hbm [thread:$0]  %s345_s25, 128, %s347_s28, [#allocation4]  }
 0x1c6   :  { %v335_v42 = vpop.f32.mrf.mxu2 }
 0x1c7   :  { %614 = dma.done.wait [#allocation4], 128  }
 0x1c8   :  { %615 = vsyncadd [#allocation4], 4294967168 }
 0x1c9   :  { %354 = vsyncpa [#allocation3], 1 }
 0x1ca   :  { %355 = vsyncpa [#allocation6], 1 }
 0x1cb   :  { %356 = vsyncpa [#allocation9], 1 }
 0x1cc   :  { %357 = vsyncpa [#allocation4], 1 }

</bundles_post_ra>
